<compile_context>
chip_gen: v7x
topology: tpu7x:2x2x1
jax: 0.10.0
libtpu: 0.0.40
codegen_flags: <defaults>
</compile_context>

<pallas_src>
import functools

import jax
import jax.numpy as jnp
from jax import lax
from jax.experimental import pallas as pl
from jax.experimental.pallas import tpu as pltpu

LN_EPS = 1e-5
LANES = 128


# ---------------------------------------------------------------- kernel ----
def _conv_subsampling_kernel(x_ref, w1_ref, b1_ref, w2_ref, b2_ref,
                             g_ref, beta_ref, o_ref, h1_ref,
                             *, tt2, t1_true, c_out_true):
    """One (batch, time-tile) grid step.

    x_ref   : (4*tt2 + 8, C_in)   halo'd input rows for this tile
                                  (row l  <->  global time 4*j*tt2 - 8 + l)
    w1_ref  : (3, C_in, C_pad)    conv1 weight, per tap
    w2_ref  : (3*C_pad, C_pad)    conv2 weight, taps stacked along rows
    h1_ref  : (2*tt2 + 1, C_pad)  VMEM scratch holding the conv1 window
    o_ref   : (tt2, C_pad)        lane-dense output tile
    """
    j = pl.program_id(1)
    h1w = 2 * tt2 + 1

    # ---- conv1 (k=3, stride=2, pad=1) + ReLU over the halo'd h1 window -----
    # h1-window row m is global h1 row  s = 2*j*tt2 - 1 + m;  tap k of row m
    # reads x_ref row 2*m + k + 5 (a native strided vld, no gather matmul).
    h1 = jnp.dot(x_ref[pl.ds(5, h1w, stride=2), :], w1_ref[0],
                 preferred_element_type=jnp.float32)
    h1 += jnp.dot(x_ref[pl.ds(6, h1w, stride=2), :], w1_ref[1],
                  preferred_element_type=jnp.float32)
    h1 += jnp.dot(x_ref[pl.ds(7, h1w, stride=2), :], w1_ref[2],
                  preferred_element_type=jnp.float32)
    h1 = jax.nn.relu(h1 + b1_ref[...])

    # Zero h1 rows outside the true sequence (they only exist because of the
    # halo / time padding); this also reproduces conv2's zero padding.
    s = 2 * j * tt2 - 1 + lax.broadcasted_iota(jnp.int32, h1.shape, 0)
    h1 = jnp.where((s >= 0) & (s < t1_true), h1, 0.0)
    h1_ref[...] = h1

    # ---- conv2 (k=3, stride=2, pad=1) + ReLU --------------------------------
    # Output row r reads h1-window rows 2*r + k.  The three taps are fused
    # into one (tt2, 3*C_pad) @ (3*C_pad, C_pad) MXU matmul (128-lane aligned
    # concat -> good systolic-array fill, single accumulate, bias folded in).
    slab2 = jnp.concatenate(
        [h1_ref[pl.ds(k, tt2, stride=2), :] for k in range(3)], axis=-1)
    h2 = jnp.dot(slab2, w2_ref[...], preferred_element_type=jnp.float32)
    h2 = jax.nn.relu(h2 + b2_ref[...])

    # ---- LayerNorm over the TRUE feature dim (one-pass variance) -----------
    # Padded lanes of h2 are exactly zero (zero-padded weights/bias), so sums
    # over the padded lane dim equal sums over the real channels.
    inv_n = 1.0 / c_out_true
    mu = jnp.sum(h2, axis=-1, keepdims=True) * inv_n
    ex2 = jnp.sum(h2 * h2, axis=-1, keepdims=True) * inv_n
    var = ex2 - mu * mu
    y = (h2 - mu) * lax.rsqrt(var + LN_EPS) * g_ref[...] + beta_ref[...]
    o_ref[...] = y.astype(o_ref.dtype)


# ------------------------------------------------------------ pallas glue ---
def conv_subsampling(x, p, *, tt2_max=128):
    """Fused ConvSubsampling forward.  x: (B, T, C_in) float32."""
    B, T, C_in = x.shape
    C_out = p["w1"].shape[-1]
    T1 = (T - 1) // 2 + 1
    T2 = (T1 - 1) // 2 + 1

    # Lane-dense channel padding (review: pad C_out to a 128-lane multiple).
    C_pad = max(LANES, ((C_out + LANES - 1) // LANES) * LANES)

    # Time tiling: each grid step emits TT2 output rows from 4*TT2 + 8 halo'd
    # input rows.  TT2 is even so the x tile stays 8-sublane aligned; 128 rows
    # keeps every per-step buffer far under v7x's 64 MiB VMEM while amortizing
    # the ~0.35us per-step overhead on v5e/v6e.
    if T2 <= tt2_max:
        TT2 = max(2, T2 + (T2 % 2))          # single tile, rounded to even
    else:
        TT2 = tt2_max                        # multiple of 8
    NT = pl.cdiv(T2, TT2)
    T2_pad = NT * TT2
    T_pad = 4 * T2_pad                       # >= T always (T2 = ceil(T/4))
    XT = 4 * TT2 + 8
    H1W = 2 * TT2 + 1

    # ---- host-side layout plumbing (index plumbing only, no compute) -------
    x_p = jnp.pad(x, ((0, 0), (0, T_pad - T), (0, 0)))
    x_main = x_p.reshape(B, NT, 4 * TT2, C_in)
    halo_src = jnp.pad(x_p, ((0, 0), (8, 0), (0, 0)))[:, :T_pad, :]
    x_halo = halo_src.reshape(B, NT, 4 * TT2, C_in)[:, :, :8, :]
    x_tiles = jnp.concatenate([x_halo, x_main], axis=2)       # (B,NT,XT,C_in)

    def pad_c(a):                            # zero-pad last (channel) dim
        return jnp.pad(a, [(0, 0)] * (a.ndim - 1) + [(0, C_pad - a.shape[-1])])

    w1 = pad_c(p["w1"])                                        # (3,C_in,C_pad)
    b1 = pad_c(p["b1"])                                        # (1,C_pad)
    w2 = jnp.pad(pad_c(p["w2"]),
                 ((0, 0), (0, C_pad - C_out), (0, 0)))         # (3,C_pad,C_pad)
    w2 = w2.reshape(3 * C_pad, C_pad)                          # tap-stacked
    b2 = pad_c(p["b2"])
    g = pad_c(p["ln_g"])
    beta = pad_c(p["ln_b"])

    kern = functools.partial(_conv_subsampling_kernel,
                             tt2=TT2, t1_true=T1, c_out_true=C_out)

    flops = 2 * B * NT * (3 * H1W * C_in * C_pad + TT2 * 3 * C_pad * C_pad)
    bytes_accessed = 4 * (x_tiles.size + B * T2_pad * C_pad + w1.size
                          + w2.size + b1.size + b2.size + g.size + beta.size)
    cost = pl.CostEstimate(flops=flops, transcendentals=B * T2_pad,
                           bytes_accessed=bytes_accessed)

    out = pl.pallas_call(
        kern,
        out_shape=jax.ShapeDtypeStruct((B, T2_pad, C_pad), x.dtype),
        grid_spec=pltpu.PrefetchScalarGridSpec(
            num_scalar_prefetch=0,
            grid=(B, NT),
            in_specs=[
                # per-tile halo'd input rows
                pl.BlockSpec((None, None, XT, C_in), lambda b, j: (b, j, 0, 0)),
                # weights / norm params: constant block index -> VMEM resident
                pl.BlockSpec((3, C_in, C_pad), lambda b, j: (0, 0, 0)),
                pl.BlockSpec((1, C_pad), lambda b, j: (0, 0)),
                pl.BlockSpec((3 * C_pad, C_pad), lambda b, j: (0, 0)),
                pl.BlockSpec((1, C_pad), lambda b, j: (0, 0)),
                pl.BlockSpec((1, C_pad), lambda b, j: (0, 0)),
                pl.BlockSpec((1, C_pad), lambda b, j: (0, 0)),
            ],
            out_specs=pl.BlockSpec((None, TT2, C_pad), lambda b, j: (b, j, 0)),
            scratch_shapes=[pltpu.VMEM((H1W, C_pad), jnp.float32)],
        ),
        compiler_params=pltpu.CompilerParams(
            dimension_semantics=("parallel", "parallel")),
        cost_estimate=cost,
    )(x_tiles, w1, b1, w2, b2, g, beta)

    return out[:, :T2, :C_out]


# --------------------------------------------------------------- params -----
def init_params(key, c_in, c_out):
    ks = iter(jax.random.split(key, 8))

    def w(shape, s=0.2):
        return (s * jax.random.normal(next(ks), shape)).astype(jnp.float32)

    p = {}
    # PyTorch Conv1d weight (C_out, C_in, K) is stored here as (K, C_in, C_out):
    #   p["w1"][k, i, o] == conv1.weight[o, i, k]
    p["w1"] = w((3, c_in, c_out));  p["b1"] = w((1, c_out))
    p["w2"] = w((3, c_out, c_out)); p["b2"] = w((1, c_out))
    p["ln_g"] = 1.0 + w((1, c_out), 0.05)
    p["ln_b"] = w((1, c_out), 0.05)
    return p


# ------------------------------------------------------- pure-JAX reference -
def ref_forward(x, p):
    HP = lax.Precision.HIGHEST

    def conv_s2(h, w, b):                       # w: (3, C_l, C_out), b: (1, C_out)
        _, T_, _ = h.shape
        t_out = (T_ - 1) // 2 + 1
        hp = jnp.pad(h, ((0, 0), (1, 1), (0, 0)))
        acc = 0.0
        for k in range(3):
            rows = hp[:, k:k + 2 * t_out:2, :]  # (B, t_out, C_l)
            acc = acc + jnp.einsum("btc,cd->btd", rows, w[k], precision=HP)
        return acc + b

    h1 = jax.nn.relu(conv_s2(x, p["w1"], p["b1"]))
    h2 = jax.nn.relu(conv_s2(h1, p["w2"], p["b2"]))
    mu = jnp.mean(h2, axis=-1, keepdims=True)
    var = jnp.mean((h2 - mu) ** 2, axis=-1, keepdims=True)
    return (h2 - mu) * lax.rsqrt(var + LN_EPS) * p["ln_g"] + p["ln_b"]


# -------------------------------------------------------------------- main --
if __name__ == "__main__":
    key = jax.random.PRNGKey(0)
    kx, kp, kx2 = jax.random.split(key, 3)

    B, C_IN, C_OUT = 2, 8, 32
    params = init_params(kp, C_IN, C_OUT)

    # Case 1: module-spec small shapes (single time tile per batch element).
    T = 16
    x = (0.5 * jax.random.normal(kx, (B, T, C_IN))).astype(jnp.float32)
    out = jax.block_until_ready(conv_subsampling(x, params))
    T1 = (T - 1) // 2 + 1
    T2 = (T1 - 1) // 2 + 1
    assert out.shape == (B, T2, C_OUT), out.shape
    assert bool(jnp.all(jnp.isfinite(out)))
    err = float(jnp.max(jnp.abs(out - ref_forward(x, params))))
    assert err < 2e-3, f"case1 max abs error vs reference: {err}"

    # Case 2: longer sequence with a tiny tile size to exercise the
    # multi-tile grid, the halo path and the padded/masked edges.
    T_b = 40
    x2 = (0.5 * jax.random.normal(kx2, (B, T_b, C_IN))).astype(jnp.float32)
    out2 = jax.block_until_ready(conv_subsampling(x2, params, tt2_max=4))
    T1b = (T_b - 1) // 2 + 1
    T2b = (T1b - 1) // 2 + 1
    assert out2.shape == (B, T2b, C_OUT), out2.shape
    assert bool(jnp.all(jnp.isfinite(out2)))
    err2 = float(jnp.max(jnp.abs(out2 - ref_forward(x2, params))))
    assert err2 < 2e-3, f"case2 max abs error vs reference: {err2}"

    print("KERNEL_OK")
</pallas_src>

<mosaic_0001>
module attributes {stable_mosaic.version = 11 : i64} {
  func.func @_conv_subsampling_kernel(%arg0: i32, %arg1: i32, %arg2: memref<1x1x24x8xf32, #tpu.memory_space<vmem>>, %arg3: memref<3x8x128xf32, #tpu.memory_space<vmem>>, %arg4: memref<1x128xf32, #tpu.memory_space<vmem>>, %arg5: memref<384x128xf32, #tpu.memory_space<vmem>>, %arg6: memref<1x128xf32, #tpu.memory_space<vmem>>, %arg7: memref<1x128xf32, #tpu.memory_space<vmem>>, %arg8: memref<1x128xf32, #tpu.memory_space<vmem>>, %arg9: memref<1x4x128xf32, #tpu.memory_space<vmem>>, %arg10: memref<9x128xf32, #tpu.memory_space<vmem>>) attributes {dimension_semantics = [#tpu.dimension_semantics<parallel>, #tpu.dimension_semantics<parallel>], iteration_bounds = array<i64: 2, 1>, scalar_prefetch = 0 : i64, scratch_operands = 1 : i64, tpu.core_type = #tpu.core_type<tc>, window_params = [{transform_indices = @transform_0, window_bounds = array<i64: 1, 1, 24, 8>}, {pipeline_mode = #tpu.pipeline_mode<synchronous>, transform_indices = @transform_1, window_bounds = array<i64: 3, 8, 128>}, {pipeline_mode = #tpu.pipeline_mode<synchronous>, transform_indices = @transform_2, window_bounds = array<i64: 1, 128>}, {pipeline_mode = #tpu.pipeline_mode<synchronous>, transform_indices = @transform_3, window_bounds = array<i64: 384, 128>}, {pipeline_mode = #tpu.pipeline_mode<synchronous>, transform_indices = @transform_4, window_bounds = array<i64: 1, 128>}, {pipeline_mode = #tpu.pipeline_mode<synchronous>, transform_indices = @transform_5, window_bounds = array<i64: 1, 128>}, {pipeline_mode = #tpu.pipeline_mode<synchronous>, transform_indices = @transform_6, window_bounds = array<i64: 1, 128>}, {transform_indices = @transform_7, window_bounds = array<i64: 1, 4, 128>}]} {
    %c0 = arith.constant 0 : index
    %c0_0 = arith.constant 0 : index
    %c5 = arith.constant 5 : index
    %c0_1 = arith.constant 0 : index
    %0 = tpu.strided_load %arg2[%c0, %c0_0, %c5, %c0_1] {strides = array<i32: 1, 1, 2, 1>} : memref<1x1x24x8xf32, #tpu.memory_space<vmem>>, vector<1x1x9x8xf32>
    %1 = vector.shape_cast %0 : vector<1x1x9x8xf32> to vector<9x8xf32>
    %c0_2 = arith.constant 0 : index
    %c0_3 = arith.constant 0 : index
    %c0_4 = arith.constant 0 : index
    %2 = vector.load %arg3[%c0_2, %c0_3, %c0_4] : memref<3x8x128xf32, #tpu.memory_space<vmem>>, vector<1x8x128xf32>
    %3 = vector.shape_cast %2 : vector<1x8x128xf32> to vector<8x128xf32>
    %cst = arith.constant dense<0.000000e+00> : vector<9x128xf32>
    %4 = tpu.matmul %1, %3, %cst {dimension_numbers = #tpu.dot_dimension_numbers<[1], [0], [0], [1], [0, 0, 1, 1], [], []>} : vector<9x8xf32>, vector<8x128xf32>, vector<9x128xf32> -> vector<9x128xf32>
    %c0_5 = arith.constant 0 : index
    %c0_6 = arith.constant 0 : index
    %c6 = arith.constant 6 : index
    %c0_7 = arith.constant 0 : index
    %5 = tpu.strided_load %arg2[%c0_5, %c0_6, %c6, %c0_7] {strides = array<i32: 1, 1, 2, 1>} : memref<1x1x24x8xf32, #tpu.memory_space<vmem>>, vector<1x1x9x8xf32>
    %6 = vector.shape_cast %5 : vector<1x1x9x8xf32> to vector<9x8xf32>
    %c1 = arith.constant 1 : index
    %c0_8 = arith.constant 0 : index
    %c0_9 = arith.constant 0 : index
    %7 = vector.load %arg3[%c1, %c0_8, %c0_9] : memref<3x8x128xf32, #tpu.memory_space<vmem>>, vector<1x8x128xf32>
    %8 = vector.shape_cast %7 : vector<1x8x128xf32> to vector<8x128xf32>
    %cst_10 = arith.constant dense<0.000000e+00> : vector<9x128xf32>
    %9 = tpu.matmul %6, %8, %cst_10 {dimension_numbers = #tpu.dot_dimension_numbers<[1], [0], [0], [1], [0, 0, 1, 1], [], []>} : vector<9x8xf32>, vector<8x128xf32>, vector<9x128xf32> -> vector<9x128xf32>
    %10 = arith.addf %4, %9 : vector<9x128xf32>
    %c0_11 = arith.constant 0 : index
    %c0_12 = arith.constant 0 : index
    %c7 = arith.constant 7 : index
    %c0_13 = arith.constant 0 : index
    %11 = tpu.strided_load %arg2[%c0_11, %c0_12, %c7, %c0_13] {strides = array<i32: 1, 1, 2, 1>} : memref<1x1x24x8xf32, #tpu.memory_space<vmem>>, vector<1x1x9x8xf32>
    %12 = vector.shape_cast %11 : vector<1x1x9x8xf32> to vector<9x8xf32>
    %c2 = arith.constant 2 : index
    %c0_14 = arith.constant 0 : index
    %c0_15 = arith.constant 0 : index
    %13 = vector.load %arg3[%c2, %c0_14, %c0_15] : memref<3x8x128xf32, #tpu.memory_space<vmem>>, vector<1x8x128xf32>
    %14 = vector.shape_cast %13 : vector<1x8x128xf32> to vector<8x128xf32>
    %cst_16 = arith.constant dense<0.000000e+00> : vector<9x128xf32>
    %15 = tpu.matmul %12, %14, %cst_16 {dimension_numbers = #tpu.dot_dimension_numbers<[1], [0], [0], [1], [0, 0, 1, 1], [], []>} : vector<9x8xf32>, vector<8x128xf32>, vector<9x128xf32> -> vector<9x128xf32>
    %16 = arith.addf %10, %15 : vector<9x128xf32>
    %c0_17 = arith.constant 0 : index
    %c0_18 = arith.constant 0 : index
    %17 = vector.load %arg4[%c0_17, %c0_18] : memref<1x128xf32, #tpu.memory_space<vmem>>, vector<1x128xf32>
    %18 = vector.broadcast %17 : vector<1x128xf32> to vector<9x128xf32>
    %19 = arith.addf %16, %18 : vector<9x128xf32>
    %cst_19 = arith.constant 0.000000e+00 : f32
    %20 = vector.broadcast %cst_19 : f32 to vector<9x128xf32>
    %21 = arith.maximumf %19, %20 : vector<9x128xf32>
    %c2_i32 = arith.constant 2 : i32
    %22 = arith.muli %c2_i32, %arg1 : i32
    %c4_i32 = arith.constant 4 : i32
    %23 = arith.muli %22, %c4_i32 : i32
    %c1_i32 = arith.constant 1 : i32
    %24 = arith.subi %23, %c1_i32 : i32
    %25 = tpu.iota {dimensions = array<i32: 0>} : vector<9x128xi32>
    %26 = vector.broadcast %24 : i32 to vector<9x128xi32>
    %27 = arith.addi %26, %25 : vector<9x128xi32>
    %c0_i32 = arith.constant 0 : i32
    %28 = vector.broadcast %c0_i32 : i32 to vector<9x128xi32>
    %29 = arith.cmpi sge, %27, %28 : vector<9x128xi32>
    %c8_i32 = arith.constant 8 : i32
    %30 = vector.broadcast %c8_i32 : i32 to vector<9x128xi32>
    %31 = arith.cmpi slt, %27, %30 : vector<9x128xi32>
    %32 = arith.andi %29, %31 : vector<9x128xi1>
    %cst_20 = arith.constant 0.000000e+00 : f32
    %33 = vector.broadcast %cst_20 : f32 to vector<9x128xf32>
    %34 = arith.select %32, %21, %33 : vector<9x128xi1>, vector<9x128xf32>
    %c0_21 = arith.constant 0 : index
    %c0_22 = arith.constant 0 : index
    %35 = vector.load %arg10[%c0_21, %c0_22] : memref<9x128xf32, #tpu.memory_space<vmem>>, vector<9x128xf32>
    tpu.vector_store %arg10[%c0_21, %c0_22], %34 {strides = array<i32>} : memref<9x128xf32, #tpu.memory_space<vmem>>, vector<9x128xf32>,
    %c0_23 = arith.constant 0 : index
    %c0_24 = arith.constant 0 : index
    %36 = tpu.strided_load %arg10[%c0_23, %c0_24] {strides = array<i32: 2, 1>} : memref<9x128xf32, #tpu.memory_space<vmem>>, vector<4x128xf32>
    %c1_25 = arith.constant 1 : index
    %c0_26 = arith.constant 0 : index
    %37 = tpu.strided_load %arg10[%c1_25, %c0_26] {strides = array<i32: 2, 1>} : memref<9x128xf32, #tpu.memory_space<vmem>>, vector<4x128xf32>
    %c2_27 = arith.constant 2 : index
    %c0_28 = arith.constant 0 : index
    %38 = tpu.strided_load %arg10[%c2_27, %c0_28] {strides = array<i32: 2, 1>} : memref<9x128xf32, #tpu.memory_space<vmem>>, vector<4x128xf32>
    %39 = tpu.concatenate %36, %37, %38 in 1 : vector<4x128xf32>, vector<4x128xf32>, vector<4x128xf32> -> vector<4x384xf32>
    %c0_29 = arith.constant 0 : index
    %c0_30 = arith.constant 0 : index
    %40 = vector.load %arg5[%c0_29, %c0_30] : memref<384x128xf32, #tpu.memory_space<vmem>>, vector<384x128xf32>
    %cst_31 = arith.constant dense<0.000000e+00> : vector<4x128xf32>
    %41 = tpu.matmul %39, %40, %cst_31 {dimension_numbers = #tpu.dot_dimension_numbers<[1], [0], [0], [1], [0, 0, 1, 1], [], []>} : vector<4x384xf32>, vector<384x128xf32>, vector<4x128xf32> -> vector<4x128xf32>
    %c0_32 = arith.constant 0 : index
    %c0_33 = arith.constant 0 : index
    %42 = vector.load %arg6[%c0_32, %c0_33] : memref<1x128xf32, #tpu.memory_space<vmem>>, vector<1x128xf32>
    %43 = vector.broadcast %42 : vector<1x128xf32> to vector<4x128xf32>
    %44 = arith.addf %41, %43 : vector<4x128xf32>
    %cst_34 = arith.constant 0.000000e+00 : f32
    %45 = vector.broadcast %cst_34 : f32 to vector<4x128xf32>
    %46 = arith.maximumf %44, %45 : vector<4x128xf32>
    %cst_35 = arith.constant dense<0.000000e+00> : vector<4xf32>
    %47 = vector.multi_reduction <add>, %46, %cst_35 [1] : vector<4x128xf32> to vector<4xf32>
    %48 = vector.shape_cast %47 : vector<4xf32> to vector<4x1xf32>
    %cst_36 = arith.constant 3.125000e-02 : f32
    %49 = vector.broadcast %cst_36 : f32 to vector<4x1xf32>
    %50 = arith.mulf %48, %49 : vector<4x1xf32>
    %51 = arith.mulf %46, %46 : vector<4x128xf32>
    %cst_37 = arith.constant dense<0.000000e+00> : vector<4xf32>
    %52 = vector.multi_reduction <add>, %51, %cst_37 [1] : vector<4x128xf32> to vector<4xf32>
    %53 = vector.shape_cast %52 : vector<4xf32> to vector<4x1xf32>
    %cst_38 = arith.constant 3.125000e-02 : f32
    %54 = vector.broadcast %cst_38 : f32 to vector<4x1xf32>
    %55 = arith.mulf %53, %54 : vector<4x1xf32>
    %56 = arith.mulf %50, %50 : vector<4x1xf32>
    %57 = arith.subf %55, %56 : vector<4x1xf32>
    %58 = vector.broadcast %50 : vector<4x1xf32> to vector<4x128xf32>
    %59 = arith.subf %46, %58 : vector<4x128xf32>
    %cst_39 = arith.constant 9.99999974E-6 : f32
    %60 = vector.broadcast %cst_39 : f32 to vector<4x1xf32>
    %61 = arith.addf %57, %60 : vector<4x1xf32>
    %62 = math.rsqrt %61 : vector<4x1xf32>
    %63 = vector.broadcast %62 : vector<4x1xf32> to vector<4x128xf32>
    %64 = arith.mulf %59, %63 : vector<4x128xf32>
    %c0_40 = arith.constant 0 : index
    %c0_41 = arith.constant 0 : index
    %65 = vector.load %arg7[%c0_40, %c0_41] : memref<1x128xf32, #tpu.memory_space<vmem>>, vector<1x128xf32>
    %66 = vector.broadcast %65 : vector<1x128xf32> to vector<4x128xf32>
    %67 = arith.mulf %64, %66 : vector<4x128xf32>
    %c0_42 = arith.constant 0 : index
    %c0_43 = arith.constant 0 : index
    %68 = vector.load %arg8[%c0_42, %c0_43] : memref<1x128xf32, #tpu.memory_space<vmem>>, vector<1x128xf32>
    %69 = vector.broadcast %68 : vector<1x128xf32> to vector<4x128xf32>
    %70 = arith.addf %67, %69 : vector<4x128xf32>
    %c0_44 = arith.constant 0 : index
    %c0_45 = arith.constant 0 : index
    %c0_46 = arith.constant 0 : index
    %71 = vector.load %arg9[%c0_44, %c0_45, %c0_46] : memref<1x4x128xf32, #tpu.memory_space<vmem>>, vector<1x4x128xf32>
    %72 = vector.shape_cast %71 : vector<1x4x128xf32> to vector<4x128xf32>
    %73 = vector.shape_cast %70 : vector<4x128xf32> to vector<1x4x128xf32>
    tpu.vector_store %arg9[%c0_44, %c0_45, %c0_46], %73 {strides = array<i32>} : memref<1x4x128xf32, #tpu.memory_space<vmem>>, vector<1x4x128xf32>,
    return
  }
  func.func @transform_0(%arg0: i32, %arg1: i32) -> (i32, i32, i32, i32) {
    %c0_i32 = arith.constant 0 : i32
    %c0_i32_0 = arith.constant 0 : i32
    %c0_i32_1 = arith.constant 0 : i32
    return %arg0, %arg1, %c0_i32, %c0_i32_0 : i32, i32, i32, i32
  }
  func.func @transform_1(%arg0: i32, %arg1: i32) -> (i32, i32, i32) {
    %c0_i32 = arith.constant 0 : i32
    %c0_i32_0 = arith.constant 0 : i32
    %c0_i32_1 = arith.constant 0 : i32
    %c0_i32_2 = arith.constant 0 : i32
    return %c0_i32, %c0_i32_0, %c0_i32_1 : i32, i32, i32
  }
  func.func @transform_2(%arg0: i32, %arg1: i32) -> (i32, i32) {
    %c0_i32 = arith.constant 0 : i32
    %c0_i32_0 = arith.constant 0 : i32
    %c0_i32_1 = arith.constant 0 : i32
    return %c0_i32, %c0_i32_0 : i32, i32
  }
  func.func @transform_3(%arg0: i32, %arg1: i32) -> (i32, i32) {
    %c0_i32 = arith.constant 0 : i32
    %c0_i32_0 = arith.constant 0 : i32
    %c0_i32_1 = arith.constant 0 : i32
    return %c0_i32, %c0_i32_0 : i32, i32
  }
  func.func @transform_4(%arg0: i32, %arg1: i32) -> (i32, i32) {
    %c0_i32 = arith.constant 0 : i32
    %c0_i32_0 = arith.constant 0 : i32
    %c0_i32_1 = arith.constant 0 : i32
    return %c0_i32, %c0_i32_0 : i32, i32
  }
  func.func @transform_5(%arg0: i32, %arg1: i32) -> (i32, i32) {
    %c0_i32 = arith.constant 0 : i32
    %c0_i32_0 = arith.constant 0 : i32
    %c0_i32_1 = arith.constant 0 : i32
    return %c0_i32, %c0_i32_0 : i32, i32
  }
  func.func @transform_6(%arg0: i32, %arg1: i32) -> (i32, i32) {
    %c0_i32 = arith.constant 0 : i32
    %c0_i32_0 = arith.constant 0 : i32
    %c0_i32_1 = arith.constant 0 : i32
    return %c0_i32, %c0_i32_0 : i32, i32
  }
  func.func @transform_7(%arg0: i32, %arg1: i32) -> (i32, i32, i32) {
    %c0_i32 = arith.constant 0 : i32
    %c0_i32_0 = arith.constant 0 : i32
    return %arg0, %arg1, %c0_i32 : i32, i32, i32
  }
}

</mosaic_0001>

<bundles_post_ra>
// kernel: tpu_custom_call.1
= control target key start
LH: loop header
LB: loop body
LE: loop exit
PB: predicated region body
PF: predicated region fallthrough
CT: control target
= control target key end

     0   :  { %12 = vsyncpa [#allocation4], 0  ;;  %s1578_s0 = inlined_call_operand.vmem [shape: f32[2,1,24,8], index: 0, kind: input, shape index: {}]   ;;  %s1579_s1 = inlined_call_operand.vmem [shape: f32[3,8,128], index: 1, kind: input, shape index: {}]   ;;  %s1580_s2 = inlined_call_operand.vmem [shape: f32[1,128], index: 2, kind: input, shape index: {}]   ;;  %s1581_s3 = inlined_call_operand.hbm [shape: f32[384,128], index: 3, kind: input, shape index: {}]   ;;  %s1582_s4 = inlined_call_operand.vmem [shape: f32[1,128], index: 4, kind: input, shape index: {}]   ;;  %s1583_s5 = inlined_call_operand.vmem [shape: f32[1,128], index: 5, kind: input, shape index: {}]   ;;  %s1584_s6 = inlined_call_operand.vmem [shape: f32[1,128], index: 6, kind: input, shape index: {}]   ;;  %s1585_s7 = inlined_call_operand.hbm [shape: f32[2,4,128], index: 7, kind: output, shape index: {}]  }
   0x1   :  { %13 = vsyncpa [#allocation5], 0 }
   0x2   :  { %15 = vsyncpa [#allocation5 + $0x1], 0  ;;  %s1385_s24 = smov 0   ;;  %s1387_s25 = smov 0  }
   0x3   :  { %s1389_s26 = smov 0   ;;  %s1391_s27 = smov 0  }
   0x4   :  { %s1393_s28 = smov 0   ;;  %s1395_s29 = smov 0  }
   0x5 LB: > { %s950_s30 = sadd.s32 4294967295, %s1336_s29   ;;  %s951_s8 = sadd.s32 4294967294, %s1336_s29   ;;  %s1336_s29 = sphi %s1395_s29, %s21_s29   ;;  %s1332_s28 = sphi %s1393_s28, %s1603_s28   ;;  %s1328_s27 = sphi %s1391_s27, %s1602_s27   ;;  %s1324_s26 = sphi %s1389_s26, %s1601_s26   ;;  %s1320_s25 = sphi %s1387_s25, %s1600_s25   ;;  %s1316_s24 = sphi %s1385_s24, %s1599_s24  }
   0x6   : > { %s33_s9 = sadd.s32 1, %s1332_s28  ;;  %s196_s10 = sadd.s32 1, %s1324_s26 }
   0x7   : > { %p35_p0 = scmp.ge.s32.totalorder %s33_s9, 2  ;;  %p206_p1 = scmp.ne.s32.totalorder %s1324_s26, %s1320_s25 }
   0x8   : > { %p207_p2 = scmp.eq.s32.totalorder %s950_s30, 1  ;;  %p212_p3 = scmp.ne.s32.totalorder %s1320_s25, %s1316_s24 }
   0x9   : > { %s1605_s9 = smov (%p35_p0, %s33_s9), 0  ;;  %p213_p5 = scmp.eq.s32.totalorder %s951_s8, 1 }
   0xa   : > { %p1425_p4 = por %p207_p2, %p206_p1  ;;  %s191_s12 = ssub.s32 %s1332_s28, %s1605_s9 }
   0xb   : > { %p952_p6 = scmp.ge.s32.totalorder %s1336_s29, 1  ;;  %p194_p7 = scmp.eq.s32.totalorder %s191_s12, 0 }
   0xc   : > { %s1590_s11 = scalar_select %p1425_p4, 1, 0 }
   0xd   : > { %p1432_p8 = por %p213_p5, %p212_p3  ;;  %p220_p9 = scmp.lt.s32.totalorder %s1336_s29, 3 }
   0xe   : > { %s1438_s14 = scalar_select %p194_p7, %s1324_s26, %s196_s10  }
   0xf   : > { %s1591_s13 = scalar_select %p1432_p8, 1, 0 }
  0x10   : > { %p1440_p10 = pnand %p952_p6, %p220_p9  ;;  %p1444_p11 = scmp.eq.s32.totalorder %s950_s30, 0 }
  0x11   : > { %s1338_s17 = smov [#allocation3]   ;;  %s1226_s22 = scalar_lea.hbm %s1581_s3, 6144 }
  0x12   : > { %s1592_s15 = scalar_select %p1440_p10, 1, 0 }
  0x13   : > { %s1593_s16 = scalar_select %p1444_p11, 1, 0 }
  0x14   : > { %p1159_p12 = pneg %p1440_p10  ;;  %s238_s18 = sshll.u32 %s1338_s17, 4  ;;  %s239_s18 = int_to_ptr.vmem [resolvable:$true] %s238_s18 }
  0x15   : > { %p1227_p0 = scmp.ne.s32.totalorder %s1581_s3, %s1226_s22  ;;  %p1233_p5 = scmp.lt.u32.totalorder %s1226_s22, %s1581_s3 }
  0x16   : > { %p1452_p13 = pnand %p1444_p11, %p1159_p12 }
  0x18   : > { %p1228_p1 = pneg %p1452_p13 }
  0x1a   : > { %p1229_p2 = pnand %p1228_p1, %p1227_p0 }
  0x1c   : > { %p1230_p3 = pneg %p1229_p2 }
  0x1e   : > { %p1235_p6 = pnand %p1233_p5, %p1230_p3 }
  0x20   : > { %1238 = shalt.err (!%p1235_p6)
}
  0x21   : > { %s1239_s12 = scalar_lea.vmem %s239_s18, 6144  ;;  %p1247_p8 = scmp.lt.s32.totalorder %s239_s18, %s239_s18 }
  0x22   : > { %p1240_p7 = scmp.ne.s32.totalorder %s239_s18, %s1239_s12  ;;  %p1248_p4 = scmp.lt.s32.totalorder %s1239_s12, %s1239_s12 }
  0x24   : > { %p1242_p9 = pnand %p1240_p7, %p1228_p1  ;;  %p1249_p11 = por %p1248_p4, %p1247_p8 }
  0x26   : > { %p1243_p12 = pneg %p1242_p9 }
  0x28   : > { %p1250_p10 = pnand %p1249_p11, %p1243_p12 }
  0x2a   : > { %1253 = shalt.err (!%p1250_p10)
}
  0x2b   : > { %s1339_s17 = smov 128   ;;  %s1340_s20 = smov 8  }
  0x2c   : > { %1162 = dma.hbm_to_vmem [thread:$0]  (!%p1452_p13), %s1581_s3, 6144, %s239_s18, [#allocation4], %s1339_s17, %s1339_s17, %s1340_s20  }
  0x2d   : > { %p1595_p0 = scmp.ne.s32.totalorder %s1592_s15, 0 }
  0x2e   : > { %p1596_p2 = scmp.ne.s32.totalorder (!%p1595_p0), %s1593_s16, 0 }
  0x2f   : > { %275 = sbr.rel (%p1595_p0) target bundleno = 706 (0x2c2), region = 48 }
  0x36   : > { %1307 = dma.done.wait (%p1596_p2), [#allocation4], 6144  }
  0x37   : > { %1309 = vsyncadd (%p1596_p2), [#allocation4], 4294961152  ;;  %p311_p4 = scmp.lt.s32.totalorder %s1328_s27, 1  ;;  %vm331_vm0 = vcmask 64512   ;;  %v324_v0 = vld [vmem:[%s1579_s1] sm:$0xff]  ;;  %v970_v3 = vld [vmem:[%s1579_s1 + $0x10] sm:$0xff] }
  0x38   : > { %1047 = vmatprep.subr.mxu0 %v324_v0  ;;  %v963_v4 = vld [vmem:[%s1579_s1 + $0x8] sm:$0xff]  ;;  %v633_v7 = vld [vmem:[#allocation3 + $0x80] sm:$0xff]  ;;  %v634_v9 = vld [vmem:[#allocation3 + $0x88] sm:$0xff]  ;;  %v1341_v18 = vmov 0.0|0.0   ;;  %vm1342_vm1 = vmmov 0   ;;  %vm813_vm4 = vcmask 1043456  }
  0x39   : > { %s312_s22 = scalar_select %p311_p4, %s1328_s27, 1  ;;  %1048 = vmatpush3.msra.mxu0 %v324_v0  ;;  %1042 = vmatprep.subr.mxu1 %v963_v4  ;;  %v1092_v10 = vpack.c.bf16 %v634_v9, %v633_v7  ;;  %v649_v11 = vld [vmem:[#allocation3 + $0x100] sm:$0xff]  ;;  %v618_v13 = vld [vmem:[#allocation3 + $0x8] sm:$0xff]  ;;  %v635_v16 = vld [vmem:[#allocation3 + $0x90] sm:$0xff] }
  0x3a   : > { %1052 = vmatprep.subr.mxu0 %v970_v3  ;;  %1043 = vmatpush3.msra.mxu1 %v963_v4  ;;  %v617_v12 = vld [vmem:[#allocation3] sm:$0xff]  ;;  %v650_v14 = vld [vmem:[#allocation3 + $0x108] sm:$0xff]  ;;  %v636_v17 = vld [vmem:[#allocation3 + $0x98] sm:$0xff]  ;;  %s308_s19 = sand.u32 1, %s1320_s25   ;;  %s978_s12 = sshll.u32 %s1328_s27, 6 }
  0x3b   : > { %s1152_s30 = smul.u32 24, %s312_s22  ;;  %v1094_v15 = vpack.c.bf16 %v618_v13, %v617_v12  ;;  %v1096_v19 = vpack.c.bf16 %v636_v17, %v635_v16  ;;  %v619_v20 = vld [vmem:[#allocation3 + $0x10] sm:$0xff]  ;;  %v620_v21 = vld [vmem:[#allocation3 + $0x18] sm:$0xff]  ;;  %1093 = vmatprep.subr.bf16.mxu1 %v1092_v10  ;;  %v637_v22 = vld [vmem:[#allocation3 + $0xa0] sm:$0xff]  ;;  %v1125_v25 = vpack.c.bf16 %v650_v14, %v649_v11  ;;  %v1343_v16 = vmov 0.0   ;;  %s957_s8 = sshll.u32 %s308_s19, 2 }
  0x3c   : > { %v638_v23 = vld [vmem:[#allocation3 + $0xa8] sm:$0xff]  ;;  %v651_v26 = vld [vmem:[#allocation3 + $0x110] sm:$0xff]  ;;  %v1098_v27 = vpack.c.bf16 %v620_v21, %v619_v20  ;;  %v652_v28 = vld [vmem:[#allocation3 + $0x118] sm:$0xff]  ;;  %v596_v20 = vlaneseq  ;;  %s310_s17 = scalar_lea.vmem [#allocation6], %s957_s8  ;;  %s1531_s22 = scalar_lea.hbm %s1585_s7, %s978_s12 }
  0x3d   : > { %s1483_s10 = scalar_lea.vmem %s1578_s0, %s1152_s30  ;;  %v1100_v29 = vpack.c.bf16 %v638_v23, %v637_v22  ;;  %v621_v30 = vld [vmem:[#allocation3 + $0x20] sm:$0xff]  ;;  %v622_v31 = vld [vmem:[#allocation3 + $0x28] sm:$0xff]  ;;  %v639_v32 = vld [vmem:[#allocation3 + $0xb0] sm:$0xff]  ;;  %v1128_v34 = vpack.c.bf16 %v652_v28, %v651_v26  ;;  %s861_s20 = sshll.u32 %s310_s17, 4  ;;  %s1533_s20 = int_to_ptr.vmem [resolvable:$true] %s861_s20 }
  0x3e   : > { %v959_v1 = vld [vmem:[%s1483_s10 + $0x5] ss:$2 sm:$0xff]  ;;  %v960_v2 = vld [vmem:[%s1483_s10 + $0x15] ss:$2 sm:$0x1]  ;;  %v1102_v36 = vpack.c.bf16 %v622_v31, %v621_v30  ;;  %v654_v37 = vld [vmem:[#allocation3 + $0x128] sm:$0xff] }
  0x3f   : > { %1049 = vmatprep.mubr.msk.f32.mxu0 %vm331_vm0, %v959_v1  ;;  %v961_v5 = vld [vmem:[%s1483_s10 + $0x6] ss:$2 sm:$0xff]  ;;  %v968_v6 = vld [vmem:[%s1483_s10 + $0x7] ss:$2 sm:$0xff]  ;;  %v642_v47 = vld [vmem:[#allocation3 + $0xc8] sm:$0xff]  ;;  %v597_v21 = vshrl.u32 %v596_v20, 7 }
  0x40   : > { %1050 = vmatmul.mubr.msk.f32.vlgmr.msra.gmra.mrb[0].mxu0 %vm331_vm0, %v960_v2  ;;  %v962_v8 = vld [vmem:[%s1483_s10 + $0x16] ss:$2 sm:$0x1]  ;;  %1044 = vmatprep.mubr.msk.f32.mxu1 %vm331_vm0, %v961_v5  ;;  %v969_v24 = vld [vmem:[%s1483_s10 + $0x17] ss:$2 sm:$0x1] }
  0x41   : > { %1053 = vmatpush3.msra.mxu0 %v970_v3  ;;  %1054 = vmatprep.mubr.msk.f32.mxu0 %vm331_vm0, %v968_v6  ;;  %v640_v33 = vld [vmem:[#allocation3 + $0xb8] sm:$0xff]  ;;  %v653_v35 = vld [vmem:[#allocation3 + $0x120] sm:$0xff]  ;;  %v623_v39 = vld [vmem:[#allocation3 + $0x30] sm:$0xff]  ;;  %v598_v23 = vadd.s32 8, %v597_v21  ;;  %v600_v30 = vadd.s32 4294967295, %v597_v21  ;;  %s847_s30 = scalar_lea.sflag [#allocation5], %s308_s19 }
  0x42   : > { %1045 = vmatmul.mubr.msk.f32.vlgmr.msra.gmra.mrb[0].mxu1 %vm331_vm0, %v962_v8  ;;  %1124 = vmatprep.subr.bf16.mxu0 %v1341_v18  ;;  %v1104_v38 = vpack.c.bf16 %v640_v33, %v639_v32  ;;  %v624_v40 = vld [vmem:[#allocation3 + $0x38] sm:$0xff]  ;;  %v1131_v41 = vpack.c.bf16 %v654_v37, %v653_v35  ;;  %v655_v43 = vld [vmem:[#allocation3 + $0x130] sm:$0xff]  ;;  %v641_v46 = vld [vmem:[#allocation3 + $0xc0] sm:$0xff]  ;;  %s1254_s10 = scalar_lea.vmem %s1533_s20, 64  ;;  %p1597_p10 = scmp.ne.s32.totalorder %s1590_s11, 0 }
  0x43   : > { %1095 = vmatpush3.bf16.msra.mxu1 %v1094_v15  ;;  %v1106_v42 = vpack.c.bf16 %v624_v40, %v623_v39  ;;  %v656_v44 = vld [vmem:[#allocation3 + $0x138] sm:$0xff]  ;;  %v657_v48 = vld [vmem:[#allocation3 + $0x140] sm:$0xff]  ;;  %v1108_v49 = vpack.c.bf16 %v642_v47, %v641_v46  ;;  %v658_v50 = vld [vmem:[#allocation3 + $0x148] sm:$0xff]  ;;  %vm602_vm3 = vcmp.ge.s32.totalorder %v600_v30, 0  ;;  %p1255_p8 = scmp.ne.s32.totalorder %s1533_s20, %s1254_s10  ;;  %s1344_s27 = smov [#allocation6]  }
  0x44   : > { %1097 = vmatprep.subr.bf16.mxu1 %v1096_v19  ;;  %v1134_v45 = vpack.c.bf16 %v656_v44, %v655_v43  ;;  %v625_v51 = vld [vmem:[#allocation3 + $0x40] sm:$0xff]  ;;  %v626_v52 = vld [vmem:[#allocation3 + $0x48] sm:$0xff]  ;;  %v1137_v53 = vpack.c.bf16 %v658_v50, %v657_v48  ;;  %v643_v55 = vld [vmem:[#allocation3 + $0xd0] sm:$0xff]  ;;  %s1258_s8 = sshll.u32 %s1344_s27, 4  ;;  %s1259_s8 = int_to_ptr.vmem [resolvable:$false] %s1258_s8 }
  0x45   : > { %v1110_v54 = vpack.c.bf16 %v626_v52, %v625_v51  ;;  %v644_v56 = vld [vmem:[#allocation3 + $0xd8] sm:$0xff]  ;;  %v659_v57 = vld [vmem:[#allocation3 + $0x150] sm:$0xff]  ;;  %v645_v0 = vld [vmem:[#allocation3 + $0xe0] sm:$0xff]  ;;  %p1256_p11 = pnand %p1255_p8, %p1597_p10  ;;  %s1260_s18 = scalar_lea.vmem %s1259_s8, 128 }
  0x46   : > { %v1112_v58 = vpack.c.bf16 %v644_v56, %v643_v55  ;;  %v660_v59 = vld [vmem:[#allocation3 + $0x158] sm:$0xff]  ;;  %v627_v60 = vld [vmem:[#allocation3 + $0x50] sm:$0xff]  ;;  %v646_v1 = vld [vmem:[#allocation3 + $0xe8] sm:$0xff]  ;;  %p1261_p1 = scmp.lt.s32.totalorder %s1533_s20, %s1259_s8  ;;  %p1262_p3 = scmp.lt.s32.totalorder %s1260_s18, %s1254_s10 }
  0x47   : > { %1099 = vmatpush3.bf16.msra.mxu1 %v1098_v27  ;;  %v628_v61 = vld [vmem:[#allocation3 + $0x58] sm:$0xff]  ;;  %v1140_v62 = vpack.c.bf16 %v660_v59, %v659_v57  ;;  %v661_v2 = vld [vmem:[#allocation3 + $0x160] sm:$0xff]  ;;  %v1116_v3 = vpack.c.bf16 %v646_v1, %v645_v0  ;;  %v662_v4 = vld [vmem:[#allocation3 + $0x168] sm:$0xff]  ;;  %v601_v27 = vadd.s32 4294967295, %v598_v23  ;;  %p1257_p13 = pneg %p1256_p11 }
  0x48   : > { %1055 = vmatmul.mubr.msk.f32.vlgmr.msra.gmra.mrb[0].mxu0 %vm331_vm0, %v969_v24  ;;  %1101 = vmatprep.subr.bf16.mxu1 %v1100_v29  ;;  %v1114_v63 = vpack.c.bf16 %v628_v61, %v627_v60  ;;  %v629_v5 = vld [vmem:[#allocation3 + $0x60] sm:$0xff]  ;;  %v630_v6 = vld [vmem:[#allocation3 + $0x68] sm:$0xff]  ;;  %v1143_v7 = vpack.c.bf16 %v662_v4, %v661_v2  ;;  %v647_v9 = vld [vmem:[#allocation3 + $0xf0] sm:$0xff]  ;;  %p1263_p5 = por %p1262_p3, %p1261_p1 }
  0x49   : > { %1126 = vmatpush3.bf16.msra.mxu0 %v1125_v25  ;;  %v1118_v8 = vpack.c.bf16 %v630_v6, %v629_v5  ;;  %v648_v10 = vld [vmem:[#allocation3 + $0xf8] sm:$0xff]  ;;  %v663_v11 = vld [vmem:[#allocation3 + $0x170] sm:$0xff]  ;;  %1089 = vmatprep.mubr.msk.f32.mxu0 %vm1342_vm1, %v1343_v16  ;;  %vm605_vm2 = vcmp.lt.s32.totalorder %v601_v27, 8 }
  0x4a   : > { %1127 = vmatprep.subr.bf16.mxu0 %v1341_v18  ;;  %v1120_v12 = vpack.c.bf16 %v648_v10, %v647_v9  ;;  %v664_v13 = vld [vmem:[#allocation3 + $0x178] sm:$0xff]  ;;  %v631_v14 = vld [vmem:[#allocation3 + $0x70] sm:$0xff]  ;;  %p1264_p6 = pnand %p1263_p5, %p1257_p13 }
  0x4b   : > { %1103 = vmatpush3.bf16.msra.mxu1 %v1102_v36  ;;  %v632_v15 = vld [vmem:[#allocation3 + $0x78] sm:$0xff]  ;;  %v1146_v17 = vpack.c.bf16 %v664_v13, %v663_v11  ;;  %v973_v26 = vld [vmem:[%s1580_s2] ss:$0 sm:$0xff] }
  0x4c   : > { %1105 = vmatprep.subr.bf16.mxu1 %v1104_v38  ;;  %v1122_v19 = vpack.c.bf16 %v632_v15, %v631_v14  ;;  %v974_v43 = vld [vmem:[%s1582_s4] ss:$0 sm:$0xff] }
  0x4d   : > { %1129 = vmatpush3.bf16.msra.mxu0 %v1128_v34  ;;  %v975_v61 = vld [vmem:[%s1583_s5] ss:$0 sm:$0xff] }
  0x4e   : > { %1130 = vmatprep.subr.bf16.mxu0 %v1341_v18 }
  0x4f   : > { %1107 = vmatpush3.bf16.msra.mxu1 %v1106_v42 }
  0x50   : > { %1109 = vmatprep.subr.bf16.mxu1 %v1108_v49 }
  0x51   : > { %1132 = vmatpush3.bf16.msra.mxu0 %v1131_v41 }
  0x52   : > { %1133 = vmatprep.subr.bf16.mxu0 %v1341_v18 }
  0x53   : > { %1111 = vmatpush3.bf16.msra.mxu1 %v1110_v54 }
  0x54   : > { %1113 = vmatprep.subr.bf16.mxu1 %v1112_v58 }
  0x55   : > { %1135 = vmatpush3.bf16.msra.mxu0 %v1134_v45 }
  0x56   : > { %1136 = vmatprep.subr.bf16.mxu0 %v1341_v18 }
  0x57   : > { %1115 = vmatpush3.bf16.msra.mxu1 %v1114_v63  ;;  %v976_v63 = vld [vmem:[%s1584_s6] ss:$0 sm:$0xff] }
  0x58   : > { %1117 = vmatprep.subr.bf16.mxu1 %v1116_v3 }
  0x59   : > { %1138 = vmatpush3.bf16.msra.mxu0 %v1137_v53 }
  0x5a   : > { %1139 = vmatprep.subr.bf16.mxu0 %v1341_v18 }
  0x5b   : > { %1119 = vmatpush3.bf16.msra.mxu1 %v1118_v8 }
  0x5c   : > { %1121 = vmatprep.subr.bf16.mxu1 %v1120_v12 }
  0x5d   : > { %1141 = vmatpush3.bf16.msra.mxu0 %v1140_v62 }
  0x5e   : > { %1142 = vmatprep.subr.bf16.mxu0 %v1341_v18 }
  0x5f   : > { %1123 = vmatpush3.bf16.msra.mxu1 %v1122_v19 }
  0x61   : > { %1144 = vmatpush3.bf16.msra.mxu0 %v1143_v7 }
  0x62   : > { %1145 = vmatprep.subr.bf16.mxu0 %v1341_v18 }
  0x65   : > { %1147 = vmatpush3.bf16.msra.mxu0 %v1146_v17 }
 0x115   : > { %v1046_v22 = vpop.f32.mrb[0].mxu1 }
 0x116   : > { %v404_v24 = vpop.f32.mrb[1].mxu1 }
 0x11b   : > { %v1056_v25 = vpop.f32.mrb[0].mxu0 }
 0x11c   : > { %v1148_v28 = vadd.f32 %v1056_v25, %v1046_v22  ;;  %v572_v29 = vpop.f32.mrb[1].mxu0 }
 0x11d   : > { %v1149_v31 = vadd.f32 %v572_v29, %v404_v24 }
 0x11e   : > { %v591_v32 = vadd.f32 %v1148_v28, %v973_v26 }
 0x11f   : > { %v590_v18 = vadd.f32 %v1149_v31, %v973_v26 }
 0x120   : > { %v593_v33 = vmax.f32 %v591_v32, 0.0 }
 0x121   : > { %v592_v34 = vmax.f32 %v590_v18, 0.0 }
 0x122   : > { %v609_v35 = vsel %vm605_vm2, %v593_v33, 0.0 }
 0x123   : > { %611 = vst [vmem:[#allocation2 + $0x8] sm:$0x1] %v609_v35  ;;  %v608_v36 = vsel %vm602_vm3, %v592_v34, 0.0 }
 0x124   : > { %610 = vst [vmem:[#allocation2] sm:$0xff] %v608_v36 }
 0x12b   : > { %v614_v37 = vld [vmem:[#allocation2 + $0x1] ss:$2 sm:$0xf]  ;;  %v616_v38 = vld [vmem:[#allocation2 + $0x2] ss:$2 sm:$0xf] }
 0x12c   : > { %736 = vmatprep.mubr.f32.mxu1 %v614_v37  ;;  %1090 = vmatmul.mubr.f32.vlgmr.msra.gmra.mrb[2].mxu0 %v616_v38  ;;  %v612_v39 = vld [vmem:[#allocation2] ss:$2 sm:$0xf] }
 0x12d   : > { %737 = vmatmul.mubr.f32.vlgmr.msra.gmra.mrb[2].mxu1 %v612_v39 }
 0x1ff   : > { %v808_v40 = vpop.f32.mrb[2].mxu0 }
 0x200   : > { %v1022_v41 = vpop.f32.mrb[2].mxu1  ;;  %v1091_v42 = vpop.f32.mrb[3].mxu0 }
 0x201   : > { %v1023_v44 = vpop.f32.mrb[3].mxu1 }
 0x202   : > { %v1024_v45 = vadd.f32 %v1023_v44, %v1022_v41 }
 0x204   : > { %v739_v46 = vadd.f32 %v1024_v45, %v974_v43 }
 0x206   : > { %v809_v47 = vadd.f32 %v808_v40, %v739_v46 }
 0x208   : > { %v812_v48 = vmax.f32 %v809_v47, 0.0 }
 0x20a   : > { %v814_v49 = vsel %vm813_vm4, %v812_v48, 0.0  ;;  %v818_v50 = vmul.f32 %v812_v48, %v812_v48 }
 0x20b   : > { %815 = vadd.xlane.f32.xlu0 %v814_v49 }
 0x20c   : > { %v819_v51 = vsel %vm813_vm4, %v818_v50, 0.0 }
 0x20f   : > { %820 = vadd.xlane.f32.xlu0 %v819_v51 }
 0x298   : > { %v816_v52 = vpop.xlane.xlu0 %815 }
 0x299   : > { %v817_v53 = vmul.f32 0.03125, %v816_v52 }
 0x29b   : > { %v823_v55 = vmul.f32 %v817_v53, %v817_v53  ;;  %v825_v59 = vsub.f32 %v812_v48, %v817_v53 }
 0x29c   : > { %v821_v54 = vpop.xlane.xlu0 %820 }
 0x29d   : > { %v822_v56 = vmul.f32 0.03125, %v821_v54 }
 0x29f   : > { %v824_v57 = vsub.f32 %v822_v56, %v823_v55 }
 0x2a1   : > { %v826_v58 = vadd.f32 1e-05, %v824_v57 }
 0x2a3   : > { %1224 = vrsqrt.f32 %v826_v58 }
 0x2ad   : > { %v1225_v60 = vpop.eup %1224 }
 0x2ae   : > { %v828_v62 = vmul.f32 %v1225_v60, %v825_v59 }
 0x2b0   : > { %v836_v0 = vmul.f32 %v975_v61, %v828_v62 }
 0x2b2   : > { %v844_v1 = vadd.f32 %v976_v63, %v836_v0 }
 0x2b4   : > { %845 = vst [vmem:[%s310_s17] sm:$0xf] %v844_v1 }
 0x2b5   : > { %1267 = shalt.err (!%p1264_p6)
}
 0x2b6   : > { %s1268_s19 = scalar_lea.hbm %s1531_s22, 64  ;;  %s1272_s12 = scalar_lea.hbm %s1585_s7, 128 }
 0x2b7   : > { %p1269_p7 = scmp.ne.s32.totalorder %s1531_s22, %s1268_s19  ;;  %p1273_p0 = scmp.lt.u32.totalorder %s1531_s22, %s1585_s7 }
 0x2b8   : > { %p1274_p2 = scmp.lt.u32.totalorder %s1272_s12, %s1268_s19  ;;  %p1276_p8 = scmp.lt.u32.totalorder %s1268_s19, %s1531_s22 }
 0x2b9   : > { %p1270_p9 = pnand %p1269_p7, %p1597_p10 }
 0x2ba   : > { %p1275_p4 = por %p1274_p2, %p1273_p0 }
 0x2bb   : > { %p1271_p12 = pneg %p1270_p9 }
 0x2bc   : > { %p1277_p11 = por %p1276_p8, %p1275_p4 }
 0x2be   : > { %p1278_p13 = pnand %p1277_p11, %p1271_p12 }
 0x2c0   : > { %1281 = shalt.err (!%p1278_p13)
}
 0x2c1   : > { %1157 = dma.vmem_to_hbm [thread:$0]  (%p1597_p10), %s1533_s20, 64, %s1531_s22, %s847_s30  }
 0x2c2 PF: > { %p1169_p1 = scmp.ge.s32.totalorder %s1336_s29, 2  ;;  %s873_s23 = sand.u32 1, %s1316_s24  }
 0x2c3   : > { %p1598_p3 = scmp.ne.s32.totalorder %s1591_s13, 0  ;;  %s874_s10 = scalar_lea.sflag [#allocation5], %s873_s23 }
 0x2c5   : > { %p1164_p5 = pnand %p1169_p1, %p1598_p3 }
 0x2c7   : > { %1311 = dma.done.wait (!%p1164_p5), %s874_s10, 64  }
 0x2c8   : > { %1313 = vsyncadd (!%p1164_p5), %s874_s10, 4294967232  ;;  %s21_s29 = sadd.s32 1, %s1336_s29   ;;  %s1599_s24 = smov %s1320_s25 }
 0x2c9   : > { %p18_p6 = scmp.ge.s32.totalorder %s21_s29, 4   ;;  %s1600_s25 = smov %s1324_s26 }
 0x2ca   : > { %s1601_s26 = smov %s1438_s14  ;;  %s1602_s27 = smov %s1332_s28 }
 0x2cb   : > { %s1603_s28 = smov %s1605_s9  ;;  %20 = sbr.rel (!%p18_p6) target bundleno = 5 (0x5), region = 98 }
 0x2d2   :  { %879 = vsyncpa [#allocation4], 1 }
 0x2d3   :  { %881 = vsyncpa [#allocation4 + $0x1], 1 }
 0x2d4   :  { %882 = vsyncpa [#allocation5], 1 }
 0x2d5   :  { %884 = vsyncpa [#allocation5 + $0x1], 1 }

</bundles_post_ra>
